<compile_context>
chip_gen: v7x
topology: tpu7x:2x2x1
jax: 0.10.0
libtpu: 0.0.40
codegen_flags: <defaults>
</compile_context>

<pallas_src>
import jax
import jax.numpy as jnp
from jax import lax
from jax.experimental import pallas as pl
from jax.experimental.pallas import tpu as pltpu


def _round_up(x, m):
    return ((x + m - 1) // m) * m


def _pick_token_tile(n_pad, target):
    """Largest multiple of 8 that divides n_pad and is <= target.

    Also keep >= 2 grid blocks when n_pad allows it (v7x has 2 TensorCores per
    chip; a single grid step would leave one idle)."""
    best = 8
    t = 8
    while t <= min(target, n_pad):
        if n_pad % t == 0:
            best = t
        t += 8
    if best == n_pad and n_pad >= 16:
        t, best2 = 8, 8
        while t <= n_pad // 2:
            if n_pad % t == 0:
                best2 = t
            t += 8
        best = best2
    return best


def _vmem_limit_for(needed_bytes):
    """Only raise the scoped-VMEM limit when needed; cap at ~75% of physical."""
    default_scoped = 32 * 1024 * 1024
    if needed_bytes <= default_scoped:
        return None
    cap = 48 * 1024 * 1024          # safe floor for every generation (v7x: 64 MiB physical)
    try:
        cap = max(cap, int(pltpu.get_tpu_info().vmem_capacity_bytes) * 3 // 4)
    except Exception:
        pass                         # keep the conservative 48 MiB cap
    return int(min(max(needed_bytes * 3 // 2, default_scoped), cap))


# --------------------------------------------------------------------------
# Path 1: DMA row-gather (bit-exact, bandwidth-bound; table stays in HBM).
# --------------------------------------------------------------------------
def _gather_kernel(ids_ref, table_ref, out_ref, row_buf, sem):
    # ids_ref:   SMEM (N_pad,) int32        -- scalar-prefetched token ids
    # table_ref: HBM  (V, V)                -- embedding table (never in VMEM)
    # out_ref:   VMEM (TN, V)               -- pipelined output block
    # row_buf:   VMEM (TN, V) scratch       -- DMA destination
    # sem:       DMA semaphore
    i = pl.program_id(0)
    tn, _ = out_ref.shape
    base = i * tn

    @pl.loop(0, tn)
    def _issue(n):
        tok = ids_ref[base + n]
        pltpu.make_async_copy(
            table_ref.at[pl.ds(tok, 1), :], row_buf.at[pl.ds(n, 1), :], sem
        ).start()

    @pl.loop(0, tn)
    def _drain(n):
        # All row copies have identical size, so each wait retires one of them.
        pltpu.make_async_copy(
            table_ref.at[pl.ds(0, 1), :], row_buf.at[pl.ds(0, 1), :], sem
        ).wait()

    out_ref[...] = row_buf[...]


def _gather_forward(ids_flat, emb_table, token_tile, n_tok_blocks, vmem_limit):
    n_pad = ids_flat.shape[0]
    v, d = emb_table.shape
    return pl.pallas_call(
        _gather_kernel,
        out_shape=jax.ShapeDtypeStruct((n_pad, d), emb_table.dtype),
        grid_spec=pltpu.PrefetchScalarGridSpec(
            num_scalar_prefetch=1,                     # ids -> SMEM
            grid=(n_tok_blocks,),
            in_specs=[pl.BlockSpec(memory_space=pl.ANY)],   # table stays in HBM
            out_specs=pl.BlockSpec((token_tile, d), lambda i, ids: (i, 0)),
            scratch_shapes=[
                pltpu.VMEM((token_tile, d), emb_table.dtype),
                pltpu.SemaphoreType.DMA,
            ],
        ),
        compiler_params=pltpu.CompilerParams(
            dimension_semantics=("parallel",),
            vmem_limit_bytes=vmem_limit,
        ),
    )(ids_flat, emb_table)


# --------------------------------------------------------------------------
# Path 2: one-hot MXU matmul (small V only; bf16 by default).
# --------------------------------------------------------------------------
def _onehot_matmul_kernel(ids_ref, table_ref, out_ref):
    # ids_ref:   (TN, 1) int32
    # table_ref: (V, V)  bf16/f32 (full table, constant across the grid)
    # out_ref:   (TN, V) f32
    ids = ids_ref[...]
    tn = ids.shape[0]
    v = table_ref.shape[0]
    cols = lax.broadcasted_iota(jnp.int32, (tn, v), 1)
    onehot = (ids == cols).astype(table_ref.dtype)          # exact 0/1 even in bf16
    out_ref[...] = jnp.dot(
        onehot, table_ref[...], preferred_element_type=jnp.float32
    ).astype(out_ref.dtype)


def _matmul_forward(ids_flat, emb_table, token_tile, n_tok_blocks, matmul_dtype,
                    vmem_limit):
    n_pad = ids_flat.shape[0]
    v, d = emb_table.shape
    table = emb_table.astype(matmul_dtype)
    ids2d = ids_flat.reshape(n_pad, 1)
    return pl.pallas_call(
        _onehot_matmul_kernel,
        out_shape=jax.ShapeDtypeStruct((n_pad, d), emb_table.dtype),
        grid_spec=pltpu.PrefetchScalarGridSpec(
            num_scalar_prefetch=0,
            grid=(n_tok_blocks,),
            in_specs=[
                pl.BlockSpec((token_tile, 1), lambda i: (i, 0)),
                pl.BlockSpec((v, d), lambda i: (0, 0)),      # whole (small) table
            ],
            out_specs=pl.BlockSpec((token_tile, d), lambda i: (i, 0)),
        ),
        compiler_params=pltpu.CompilerParams(
            dimension_semantics=("parallel",),
            vmem_limit_bytes=vmem_limit,
        ),
    )(ids2d, table)


# --------------------------------------------------------------------------
# Public wrapper (matches BigramLM.forward semantics).
# --------------------------------------------------------------------------
def bigram_lm_forward(token_ids, emb_table, *, token_tile=None, use_gather=None,
                      matmul_dtype=jnp.bfloat16):
    """token_ids: (B, T) int; emb_table: (V, V) float32 -> (B, T, V) float32."""
    B, T = token_ids.shape
    V, D = emb_table.shape
    assert V == D, "BigramLM uses a square (V, V) embedding table"
    N = B * T

    if use_gather is None:
        use_gather = V > 512          # matmul path only for small vocabularies

    # Minimal sublane padding; token_tile divides N_pad so no pad+slice unless
    # N itself is not a multiple of 8.
    N_pad = max(_round_up(N, 8), 8)
    ids_flat = token_ids.reshape(N).astype(jnp.int32)
    if N_pad != N:
        ids_flat = jnp.pad(ids_flat, (0, N_pad - N))

    target = token_tile if token_tile is not None else (256 if use_gather else 1024)
    tn = _pick_token_tile(N_pad, int(target))
    n_blocks = N_pad // tn

    out_itemsize = emb_table.dtype.itemsize
    if use_gather:
        needed = 3 * tn * D * out_itemsize                      # 2x out bufs + scratch
    else:
        mm_itemsize = jnp.dtype(matmul_dtype).itemsize
        needed = (2 * V * D * mm_itemsize                        # double-buffered table
                  + 2 * tn * D * out_itemsize                    # double-buffered output
                  + tn * V * mm_itemsize                         # one-hot intermediate
                  + 2 * tn * 4)                                  # ids
    vmem_limit = _vmem_limit_for(needed)

    if use_gather:
        out_flat = _gather_forward(ids_flat, emb_table, tn, n_blocks, vmem_limit)
    else:
        out_flat = _matmul_forward(ids_flat, emb_table, tn, n_blocks, matmul_dtype,
                                   vmem_limit)

    if N_pad != N:
        out_flat = out_flat[:N]
    return out_flat.reshape(B, T, V)


if __name__ == "__main__":
    vocab_size = 128
    B, T = 2, 8

    key = jax.random.PRNGKey(0)
    k_emb, k_ids = jax.random.split(key)

    # Deterministic "nn.Embedding" weight (synthetic N(0,1), like torch default).
    emb_table = jax.random.normal(k_emb, (vocab_size, vocab_size), dtype=jnp.float32)
    token_ids = jax.random.randint(k_ids, (B, T), 0, vocab_size, dtype=jnp.int32)

    # Reference: plain gather (what nn.Embedding does).
    ref = jnp.take(emb_table, token_ids, axis=0)

    # Path 1: DMA row-gather (default for large V; forced here) -- bit-exact.
    out_gather = jax.block_until_ready(
        bigram_lm_forward(token_ids, emb_table, use_gather=True))
    assert out_gather.shape == (B, T, vocab_size), out_gather.shape
    assert jnp.array_equal(out_gather, ref), "gather path mismatch vs reference"

    # Path 2: one-hot MXU matmul (small-V path), bf16 default (table rounding only).
    out_mm_bf16 = jax.block_until_ready(
        bigram_lm_forward(token_ids, emb_table, use_gather=False))
    assert out_mm_bf16.shape == (B, T, vocab_size), out_mm_bf16.shape
    assert jnp.allclose(out_mm_bf16, ref, atol=5e-2), "bf16 matmul path mismatch"

    # Path 2 with exact f32 matmul (opt-in) -- bit-exact.
    out_mm_f32 = jax.block_until_ready(
        bigram_lm_forward(token_ids, emb_table, use_gather=False,
                          matmul_dtype=jnp.float32))
    assert jnp.allclose(out_mm_f32, ref, atol=1e-6), "f32 matmul path mismatch"

    print("KERNEL_OK")
</pallas_src>

<mosaic_0001>
module attributes {stable_mosaic.version = 11 : i64} {
  func.func @_gather_kernel(%arg0: i32, %arg1: memref<16xi32, #tpu.memory_space<smem>>, %arg2: memref<128x128xf32, #tpu.memory_space<any>>, %arg3: memref<8x128xf32, #tpu.memory_space<vmem>>, %arg4: memref<8x128xf32, #tpu.memory_space<vmem>>, %arg5: memref<!tpu.dma_semaphore, #tpu.memory_space<semaphore_mem>>) attributes {dimension_semantics = [#tpu.dimension_semantics<parallel>], iteration_bounds = array<i64: 2>, scalar_prefetch = 1 : i64, scratch_operands = 2 : i64, tpu.core_type = #tpu.core_type<tc>, window_params = [{}, {transform_indices = @transform_1, window_bounds = array<i64: 8, 128>}]} {
    %c8_i32 = arith.constant 8 : i32
    %0 = arith.muli %arg0, %c8_i32 : i32
    %c0_i32 = arith.constant 0 : i32
    %c8_i32_0 = arith.constant 8 : i32
    %1 = arith.addi %c0_i32, %c8_i32_0 : i32
    %c1_i32 = arith.constant 1 : i32
    scf.for %arg6 = %c0_i32 to %1 step %c1_i32  : i32 {
      %c1_i32_8 = arith.constant 1 : i32
      %5 = arith.muli %arg6, %c1_i32_8 : i32
      %c0_i32_9 = arith.constant 0 : i32
      %6 = arith.addi %c0_i32_9, %5 : i32
      %7 = arith.addi %0, %6 : i32
      %8 = arith.index_cast %7 : i32 to index
      %9 = memref.load %arg1[%8] : memref<16xi32, #tpu.memory_space<smem>>
      %c0_i32_10 = arith.constant 0 : i32
      %10 = tpu.memref_slice %arg2[%9, %c0_i32_10] : memref<128x128xf32, #tpu.memory_space<any>> -> memref<1x128xf32, #tpu.memory_space<any>>
      %c0_i32_11 = arith.constant 0 : i32
      %11 = tpu.memref_slice %arg4[%6, %c0_i32_11] : memref<8x128xf32, #tpu.memory_space<vmem>> -> memref<1x128xf32, #tpu.memory_space<vmem>>
      tpu.enqueue_dma source(%10 : memref<1x128xf32, #tpu.memory_space<any>>) target(%11 : memref<1x128xf32, #tpu.memory_space<vmem>>) target_semaphore(%arg5 : memref<!tpu.dma_semaphore, #tpu.memory_space<semaphore_mem>>)
    }
    %c8_i32_1 = arith.constant 8 : i32
    %c0_i32_2 = arith.constant 0 : i32
    %c8_i32_3 = arith.constant 8 : i32
    %2 = arith.addi %c0_i32_2, %c8_i32_3 : i32
    %c1_i32_4 = arith.constant 1 : i32
    scf.for %arg6 = %c0_i32_2 to %2 step %c1_i32_4  : i32 {
      %c0_i32_8 = arith.constant 0 : i32
      %c0_i32_9 = arith.constant 0 : i32
      %5 = tpu.memref_slice %arg2[%c0_i32_8, %c0_i32_9] : memref<128x128xf32, #tpu.memory_space<any>> -> memref<1x128xf32, #tpu.memory_space<any>>
      %c0_i32_10 = arith.constant 0 : i32
      %c0_i32_11 = arith.constant 0 : i32
      %6 = tpu.memref_slice %arg4[%c0_i32_10, %c0_i32_11] : memref<8x128xf32, #tpu.memory_space<vmem>> -> memref<1x128xf32, #tpu.memory_space<vmem>>
      tpu.wait_dma2 semaphore(%arg5 : memref<!tpu.dma_semaphore, #tpu.memory_space<semaphore_mem>>) src(%5 : memref<1x128xf32, #tpu.memory_space<any>>) dst(%6 : memref<1x128xf32, #tpu.memory_space<vmem>>)
    }
    %c0 = arith.constant 0 : index
    %c0_5 = arith.constant 0 : index
    %3 = vector.load %arg4[%c0, %c0_5] : memref<8x128xf32, #tpu.memory_space<vmem>>, vector<8x128xf32>
    %c0_6 = arith.constant 0 : index
    %c0_7 = arith.constant 0 : index
    %4 = vector.load %arg3[%c0_6, %c0_7] : memref<8x128xf32, #tpu.memory_space<vmem>>, vector<8x128xf32>
    tpu.vector_store %arg3[%c0_6, %c0_7], %3 {strides = array<i32>} : memref<8x128xf32, #tpu.memory_space<vmem>>, vector<8x128xf32>,
    return
  }
  func.func @transform_1(%arg0: i32, %arg1: memref<16xi32, #tpu.memory_space<smem>>) -> (i32, i32) {
    %c0_i32 = arith.constant 0 : i32
    %c0_i32_0 = arith.constant 0 : i32
    return %arg0, %c0_i32 : i32, i32
  }
}

</mosaic_0001>

<bundles_post_ra>
// kernel: tpu_custom_call.1
= control target key start
LH: loop header
LB: loop body
LE: loop exit
PB: predicated region body
PF: predicated region fallthrough
CT: control target
= control target key end

     0   :  { %s469_s0 = inlined_call_operand.hbm [shape: s32[16], index: 0, kind: input, shape index: {}]   ;;  %s470_s1 = inlined_call_operand.hbm [shape: f32[128,128], index: 1, kind: input, shape index: {}]   ;;  %s471_s2 = inlined_call_operand.hbm [shape: f32[16,128], index: 2, kind: output, shape index: {}]  }
   0x1   :  { %s221_s11 = scalar_lea.hbm %s469_s0, 16 }
   0x2   :  { %p222_p0 = scmp.ne.s32.totalorder %s469_s0, %s221_s11  ;;  %p225_p1 = scmp.lt.u32.totalorder %s221_s11, %s469_s0 }
   0x4   :  { %p227_p2 = pnand %p225_p1, %p222_p0 }
   0x6   :  { %230 = shalt.err (!%p227_p2)  }
   0x7   :  { %s331_s16 = smov [#allocation5]  }
   0x8   :  { %8 = dma.hbm_to_smem %s469_s0, 16, %s331_s16, [#allocation4] }
   0x9   :  { %303 = dma.done.wait [#allocation4], 16 }
   0xa   :  { %304 = vsyncadd [#allocation4], 4294967280 }
   0xb   :  { %10 = sfence }
   0xc   :  { %11 = vsyncpa [#allocation7], 0 }
   0xd   :  { %13 = vsyncpa [#allocation7 + $0x1], 0  ;;  %s361_s19 = smov 0   ;;  %s363_s20 = smov 0  }
   0xe   :  { %s365_s21 = smov 0  }
   0xf LB: > { %s162_s0 = sadd.s32 4294967295, %s321_s21   ;;  %s378_s22 = sadd.s32 1, %s321_s21   ;;  %s321_s21 = sphi %s365_s21, %s477_s21   ;;  %s317_s20 = sphi %s363_s20, %s476_s20   ;;  %s313_s19 = sphi %s361_s19, %s475_s19  }
  0x10   : > { %s22_s23 = ssub.s32 %s321_s21, %s378_s22  ;;  %s25_s24 = sadd.s32 1, %s317_s20 }
  0x11   : > { %p23_p3 = scmp.eq.s32.totalorder %s22_s23, 0  ;;  %p163_p4 = scmp.ne.s32.totalorder %s22_s23, 0 }
  0x12   : > { %p29_p5 = scmp.eq.s32.totalorder %s321_s21, 1  ;;  %p34_p6 = scmp.ne.s32.totalorder %s317_s20, %s313_s19 }
  0x13   : > { %s387_s25 = scalar_select %p23_p3, %s317_s20, %s25_s24  }
  0x14   : > { %p389_p7 = por %p163_p4, %p29_p5  ;;  %p35_p8 = scmp.eq.s32.totalorder %s162_s0, 1 }
  0x15   : > { %p164_p10 = scmp.ge.s32.totalorder %s321_s21, 2 }
  0x16   : > { %p393_p9 = por %p35_p8, %p34_p6  ;;  %s49_s28 = sand.u32 (!%p164_p10), 1, %s317_s20  }
  0x17   : > { %44 = sbr.rel (%p164_p10) target bundleno = 98 (0x62), region = 12  ;;  %s166_s29 = sshll.u32 (!%p164_p10), %s321_s21, 3 }
  0x18   : > { %s473_s27 = scalar_select %p393_p9, 1, 0 }
  0x19   : > { %s402_s30 = sshll.u32 (!%p164_p10), %s49_s28, 3  ;;  %s405_s4 = smov (!%p164_p10), 0  }
  0x1a   : > { %s51_s3 = scalar_lea.vmem (!%p164_p10), [#allocation6], %s402_s30 }
  0x1e LB: >> { %s59_s5 = sadd.s32 %s325_s4, %s166_s29  ;;  %s63_s7 = scalar_lea.vmem [#allocation2], %s325_s4  ;;  %s325_s4 = sphi %s405_s4, %s58_s4  }
  0x1f   : >> { %s60_s6 = sld [smem:[#allocation5 + %s59_s5]]  ;;  %s71_s8 = sshll.u32 %s63_s7, 4  ;;  %s72_s8 = int_to_ptr.vmem [resolvable:$true] %s71_s8 }
  0x20   : >> { %s233_s16 = scalar_lea.hbm %s470_s1, 2048 }
  0x25   : >> { %s167_s9 = sshll.u32 %s60_s6, 4 }
  0x26   : >> { %s62_s12 = scalar_lea.hbm %s470_s1, %s167_s9 }
  0x27   : >> { %s231_s13 = scalar_lea.hbm %s62_s12, 16  ;;  %p234_p12 = scmp.lt.u32.totalorder %s62_s12, %s470_s1 }
  0x28   : >> { %p232_p11 = scmp.ne.s32.totalorder %s62_s12, %s231_s13  ;;  %p235_p13 = scmp.lt.u32.totalorder %s233_s16, %s231_s13 }
  0x29   : >> { %p237_p1 = scmp.lt.u32.totalorder %s231_s13, %s62_s12 }
  0x2a   : >> { %p236_p0 = por %p235_p13, %p234_p12 }
  0x2c   : >> { %p238_p2 = por %p237_p1, %p236_p0 }
  0x2e   : >> { %p239_p3 = pnand %p238_p2, %p232_p11 }
  0x30   : >> { %242 = shalt.err (!%p239_p3)  }
  0x31   : >> { %s243_s0 = scalar_lea.vmem %s72_s8, 16  ;;  %s332_s23 = smov [#allocation2]  }
  0x32   : >> { %p244_p4 = scmp.ne.s32.totalorder %s72_s8, %s243_s0  ;;  %s245_s24 = sshll.u32 %s332_s23, 4  ;;  %s246_s24 = int_to_ptr.vmem [resolvable:$false] %s245_s24 }
  0x33   : >> { %s247_s5 = scalar_lea.vmem %s246_s24, 128  ;;  %p248_p5 = scmp.lt.s32.totalorder %s72_s8, %s246_s24 }
  0x34   : >> { %p249_p6 = scmp.lt.s32.totalorder %s247_s5, %s243_s0 }
  0x36   : >> { %p250_p8 = por %p249_p6, %p248_p5 }
  0x38   : >> { %p251_p10 = pnand %p250_p8, %p244_p4 }
  0x3a   : >> { %254 = shalt.err (!%p251_p10)  }
  0x3b   : >> { %74 = dma.hbm_to_vmem [thread:$0]  %s62_s12, 16, %s72_s8, [#allocation3] }
  0x3c   : >> { %s58_s4 = sadd.s32 1, %s325_s4  }
  0x3d   : >> { %p55_p9 = scmp.ge.s32.totalorder %s58_s4, 8  }
  0x3e   : > { %s327_s6 = smov (%p55_p9), 0  }
  0x3f   : > { %57 = sbr.rel (!%p55_p9) target bundleno = 30 (0x1e), region = 64 }
  0x46 LB: >> { %305 = dma.done.wait [#allocation3], 16  ;;  %s329_s6 = sphi %s327_s6, %s80_s6  }
  0x47   : >> { %306 = vsyncadd [#allocation3], 4294967280  ;;  %s80_s6 = sadd.s32 1, %s329_s6  }
  0x48   : >> { %p77_p11 = scmp.ge.s32.totalorder %s80_s6, 8  }
  0x49   : > { %v84_v0 = vld [vmem:[#allocation2] sm:$0xff] (%p77_p11)  ;;  %s169_s7 = sshll.u32 (%p77_p11), %s321_s21, 7  ;;  %s100_s9 = sshll.u32 (%p77_p11), %s51_s3, 4  ;;  %s101_s9 = int_to_ptr.vmem [resolvable:$true] %s100_s9 }
  0x4a   : > { %79 = sbr.rel (!%p77_p11) target bundleno = 70 (0x46), region = 75  ;;  %85 = vst [vmem:[%s51_s3] sm:$0xff] (%p77_p11), %v84_v0  ;;  %s432_s8 = scalar_lea.hbm (%p77_p11), %s471_s2, %s169_s7 }
  0x4b   : > { %s87_s10 = scalar_lea.sflag (%p77_p11), [#allocation7], %s49_s28  ;;  %s255_s11 = scalar_lea.vmem (%p77_p11), %s101_s9, 128 }
  0x4c   : > { %p256_p9 = scmp.ne.s32.totalorder (%p77_p11), %s101_s9, %s255_s11  ;;  %s333_s12 = smov (%p77_p11), [#allocation6]  }
  0x4d   : > { %s259_s13 = sshll.u32 (%p77_p11), %s333_s12, 4  ;;  %s260_s13 = int_to_ptr.vmem [resolvable:$false] %s259_s13 }
  0x4e   : > { %p257_p12 = pnand (%p77_p11), %p256_p9, %p389_p7  ;;  %s261_s14 = scalar_lea.vmem (%p77_p11), %s260_s13, 256 }
  0x4f   : > { %p262_p0 = scmp.lt.s32.totalorder (%p77_p11), %s101_s9, %s260_s13  ;;  %p263_p1 = scmp.lt.s32.totalorder (%p77_p11), %s261_s14, %s255_s11 }
  0x50   : > { %p258_p13 = pneg (%p77_p11), %p257_p12 }
  0x51   : > { %p264_p2 = por %p263_p1, %p262_p0 }
  0x53   : > { %p265_p3 = pnand %p264_p2, %p258_p13 }
  0x55   : > { %268 = shalt.err (!%p265_p3)
}
  0x56   : > { %s269_s28 = scalar_lea.hbm %s432_s8, 128  ;;  %s273_s15 = scalar_lea.hbm %s471_s2, 256 }
  0x57   : > { %p270_p4 = scmp.ne.s32.totalorder %s432_s8, %s269_s28  ;;  %p274_p8 = scmp.lt.u32.totalorder %s432_s8, %s471_s2 }
  0x58   : > { %p275_p10 = scmp.lt.u32.totalorder %s273_s15, %s269_s28  ;;  %p277_p9 = scmp.lt.u32.totalorder %s269_s28, %s432_s8 }
  0x59   : > { %p271_p5 = pnand %p270_p4, %p389_p7 }
  0x5a   : > { %p276_p11 = por %p275_p10, %p274_p8 }
  0x5b   : > { %p272_p6 = pneg %p271_p5 }
  0x5c   : > { %p278_p12 = por %p277_p9, %p276_p11 }
  0x5e   : > { %p279_p13 = pnand %p278_p12, %p272_p6 }
  0x60   : > { %282 = shalt.err (!%p279_p13)
}
  0x61   : > { %173 = dma.vmem_to_hbm [thread:$0]  (%p389_p7), %s101_s9, 128, %s432_s8, %s87_s10  }
  0x62 PF: > { %p179_p0 = scmp.ge.s32.totalorder %s321_s21, 1  ;;  %s112_s18 = sand.u32 1, %s313_s19  }
  0x63   : > { %p474_p1 = scmp.ne.s32.totalorder %s473_s27, 0  ;;  %s113_s0 = scalar_lea.sflag [#allocation7], %s112_s18 }
  0x65   : > { %p176_p2 = pnand %p179_p0, %p474_p1 }
  0x67   : > { %308 = dma.done.wait (!%p176_p2), %s113_s0, 128  }
  0x68   : > { %310 = vsyncadd (!%p176_p2), %s113_s0, 4294967168  ;;  %p16_p3 = scmp.ge.s32.totalorder %s378_s22, 3   ;;  %s475_s19 = smov %s317_s20 }
  0x69   : > { %s476_s20 = smov %s387_s25  ;;  %s477_s21 = smov %s378_s22 }
  0x6a   :  { %18 = sbr.rel (!%p16_p3) target bundleno = 15 (0xf), region = 86 }
  0x71   :  { %118 = vsyncpa [#allocation7], 1 }
  0x72   :  { %120 = vsyncpa [#allocation7 + $0x1], 1 }
  0x73   :  { %121 = vsyncmov [#allocation3] }
  0x76   :  { %s122_s21 = vpop.sfrf %121 }
  0x77   :  { %p172_p7 = scmp.ne.s32.totalorder %s122_s21, 0 }
  0x79   :  { %126 = shalt.err (%p172_p7)  }

</bundles_post_ra>
